<compile_context>
chip_gen: v5e
topology: v5e:2x2
jax: 0.10.0
libtpu: 0.0.40
codegen_flags: <defaults>
</compile_context>

<pallas_src>
import functools

import jax
import jax.numpy as jnp
from jax.experimental import pallas as pl
from jax.experimental.pallas import tpu as pltpu

_LANE = 128
_SUBLANE = 8


def _round_up(x: int, m: int) -> int:
    return ((x + m - 1) // m) * m


def _pick_tile(dim: int, candidates) -> int:
    """Largest candidate that divides `dim`; dims are pre-padded so this hits."""
    for t in candidates:
        if t <= dim and dim % t == 0:
            return t
    return dim


def _pinv_kernel_f32(y_ref, p_ref, o_ref):
    """f32 output: accumulate directly into the resident output block."""
    @pl.when(pl.program_id(2) == 0)
    def _():
        o_ref[...] = jnp.zeros_like(o_ref)

    o_ref[...] += jnp.dot(
        y_ref[...], p_ref[...], preferred_element_type=jnp.float32
    )


def _pinv_kernel_acc(y_ref, p_ref, o_ref, acc_ref):
    """Narrow output dtypes: f32 VMEM accumulator, cast on the last k step."""
    @pl.when(pl.program_id(2) == 0)
    def _():
        acc_ref[...] = jnp.zeros_like(acc_ref)

    acc_ref[...] += jnp.dot(
        y_ref[...], p_ref[...], preferred_element_type=jnp.float32
    )

    @pl.when(pl.program_id(2) == pl.num_programs(2) - 1)
    def _():
        o_ref[...] = acc_ref[...].astype(o_ref.dtype)


@functools.partial(jax.jit, static_argnames=("n_orig", "out_dtype"))
def _apply_pinv_2d(y2d: jax.Array, pinv_t: jax.Array, n_orig: int,
                   out_dtype: str) -> jax.Array:
    """y2d: (B, M), pinv_t: (Mp, Np) padded -> (B, n_orig) via tiled Pallas matmul."""
    out_dt = jnp.dtype(out_dtype)
    B, K = y2d.shape
    Kp, Np = pinv_t.shape

    # Pad rows to a sublane multiple and K up to the padded pinv K (zero rows /
    # columns do not change the product); pinv_t was padded once at init.
    Bp = _round_up(B, _SUBLANE)
    y_p = y2d.astype(pinv_t.dtype)  # explicit dtype match -> fast MXU path
    if (Bp, Kp) != (B, K):
        y_p = jnp.pad(y_p, ((0, Bp - B), (0, Kp - K)))

    # Tiles: everything is 8/128-aligned by construction, so 128 always divides.
    tm = _pick_tile(Bp, (256, 128, 64, 32, 16, 8))
    tn = _pick_tile(Np, (1024, 512, 256, 128))
    tk = _pick_tile(Kp, (1024, 512, 256, 128))

    # v7x megacore: if the (parallel) row axis has a single block, split the
    # column axis so both TensorCores get work.  No-op on single-TC v5e/v6e.
    if Bp // tm == 1 and Np // tn == 1:
        half = Np // 2
        if half >= _LANE and half % _LANE == 0:
            tn = _pick_tile(half, (1024, 512, 256, 128))

    grid = (Bp // tm, Np // tn, Kp // tk)

    in_bytes = jnp.dtype(pinv_t.dtype).itemsize
    out_bytes = out_dt.itemsize

    use_scratch = out_dt != jnp.dtype(jnp.float32)
    if use_scratch:
        kernel = _pinv_kernel_acc
        scratch_shapes = [pltpu.VMEM((tm, tn), jnp.float32)]
        scratch_bytes = tm * tn * 4
    else:
        kernel = _pinv_kernel_f32
        scratch_shapes = []
        scratch_bytes = 0

    # Explicit VMEM budget (double-buffered inputs + output + scratch) so any
    # tile enlargement is a tunable instead of a silent v7x-only OOM.
    vmem_need = (2 * (tm * tk + tk * tn) * in_bytes
                 + 2 * tm * tn * out_bytes
                 + scratch_bytes)
    vmem_limit = int(min(max(2 * vmem_need, 32 * 1024 * 1024), 48 * 1024 * 1024))

    # bytes_accessed: y re-streamed once per column block, pinv_t once per row
    # block, output written once -- each with its own itemsize.
    cost = pl.CostEstimate(
        flops=2 * Bp * Kp * Np,
        transcendentals=0,
        bytes_accessed=(grid[1] * Bp * Kp * in_bytes
                        + grid[0] * Kp * Np * in_bytes
                        + Bp * Np * out_bytes),
    )

    out_padded = pl.pallas_call(
        kernel,
        out_shape=jax.ShapeDtypeStruct((Bp, Np), out_dt),
        grid_spec=pltpu.PrefetchScalarGridSpec(
            num_scalar_prefetch=0,
            grid=grid,
            in_specs=[
                pl.BlockSpec((tm, tk), lambda i, j, k: (i, k)),
                pl.BlockSpec((tk, tn), lambda i, j, k: (k, j)),
            ],
            out_specs=pl.BlockSpec((tm, tn), lambda i, j, k: (i, j)),
            scratch_shapes=scratch_shapes,
        ),
        compiler_params=pltpu.CompilerParams(
            dimension_semantics=("parallel", "parallel", "arbitrary"),
            vmem_limit_bytes=vmem_limit,
        ),
        cost_estimate=cost,
    )(y_p, pinv_t)

    return out_padded[:B, :n_orig]


class LinearMeasOp:
    """Minimal JAX stand-in for spyrit's Linear measurement operator.

    Holds H (M, N); the Moore-Penrose pseudo-inverse is precomputed ONCE at
    init (stored transposed, bf16, lane-padded).  `pinv(y)` applies it with
    the Pallas matmul kernel (or plain XLA in the skinny-batch regime).
    """

    def __init__(self, H: jax.Array, pinv_dtype=jnp.bfloat16):
        self.H = jnp.asarray(H, jnp.float32)
        self.M, self.N = self.H.shape
        # TODO(synk): the SVD-based Moore-Penrose pseudo-inverse itself has no
        # clean Pallas equivalent; it is computed once here via XLA and only
        # its application (y @ H_pinv^T) runs in the Pallas kernel.
        pinv_t = jnp.linalg.pinv(self.H).T.astype(pinv_dtype)  # (M, N)
        # One-time padding so every Pallas tile is lane/sublane aligned.
        Mp = _round_up(self.M, _LANE)
        Np = _round_up(self.N, _LANE)
        self.H_pinv_T = jnp.pad(pinv_t, ((0, Mp - self.M), (0, Np - self.N)))
        self._Mp, self._Np = Mp, Np

    def pinv(self, x: jax.Array, force_pallas: bool = False, **kwargs) -> jax.Array:
        leading = x.shape[:-1]
        y2d = x.reshape(-1, self.M)
        B = y2d.shape[0]
        out_dt = x.dtype

        # Skinny-batch / tiny-FLOP regime: a few-row LHS wastes the 128/256-deep
        # systolic array and per-grid-step overhead dominates -> let XLA fuse.
        flops = 2 * B * self._Mp * self._Np
        if not force_pallas and (B < 128 or flops < (1 << 24)):
            out2d = jnp.dot(
                y2d.astype(self.H_pinv_T.dtype), self.H_pinv_T,
                preferred_element_type=jnp.float32,
            )[:, : self.N].astype(out_dt)
        else:
            out2d = _apply_pinv_2d(y2d, self.H_pinv_T, self.N, str(out_dt))

        return out2d.reshape(*leading, self.N)


class PseudoInverse:
    """JAX/Pallas mirror of spyrit.core.recon.PseudoInverse."""

    def __call__(self, x: jax.Array, meas_op, **kwargs) -> jax.Array:
        return meas_op.pinv(x, **kwargs)


if __name__ == "__main__":
    key = jax.random.PRNGKey(0)
    k_h, k_y = jax.random.split(key)

    # Small shapes consistent with the module: M=128 measurements of a 16x16
    # image (N=256); measurement batch has leading dims (2, 4) -> (*, M).
    M, N = 128, 16 * 16
    H = jax.random.normal(k_h, (M, N), dtype=jnp.float32)
    y = jax.random.normal(k_y, (2, 4, M), dtype=jnp.float32)

    meas_op = LinearMeasOp(H)
    pinv_op = PseudoInverse()

    # Force the Pallas path so the kernel itself is exercised at this size.
    x_hat = pinv_op(y, meas_op, force_pallas=True)
    x_hat = jax.block_until_ready(x_hat)

    # Reference: plain-XLA application of the SAME bf16 precomputed pinv, so
    # the comparison isolates the Pallas kernel (not the bf16 quantization).
    y2d_bf16 = y.reshape(-1, M).astype(meas_op.H_pinv_T.dtype)
    ref2d = jnp.dot(y2d_bf16, meas_op.H_pinv_T,
                    preferred_element_type=jnp.float32)[:, :N]
    ref = ref2d.reshape(2, 4, N).astype(y.dtype)

    assert x_hat.shape == (2, 4, N), f"bad shape {x_hat.shape}"
    assert x_hat.dtype == y.dtype, f"bad dtype {x_hat.dtype}"
    assert jnp.allclose(x_hat, ref, rtol=1e-3, atol=1e-3), "Pallas pinv-apply mismatch"

    # Also sanity-check the auto-dispatch (XLA fallback) path agrees.
    x_auto = jax.block_until_ready(pinv_op(y, meas_op))
    assert jnp.allclose(x_auto, ref, rtol=1e-3, atol=1e-3), "fallback path mismatch"

    print("KERNEL_OK")
</pallas_src>

<mosaic_0001>
module attributes {stable_mosaic.version = 11 : i64} {
  func.func @_pinv_kernel_f32(%arg0: i32, %arg1: i32, %arg2: i32, %arg3: memref<8x128xbf16, #tpu.memory_space<vmem>>, %arg4: memref<128x128xbf16, #tpu.memory_space<vmem>>, %arg5: memref<8x128xf32, #tpu.memory_space<vmem>>) attributes {dimension_semantics = [#tpu.dimension_semantics<parallel>, #tpu.dimension_semantics<parallel>, #tpu.dimension_semantics<arbitrary>], iteration_bounds = array<i64: 1, 2, 1>, scalar_prefetch = 0 : i64, scratch_operands = 0 : i64, tpu.core_type = #tpu.core_type<tc>, window_params = [{transform_indices = @transform_0, window_bounds = array<i64: 8, 128>}, {transform_indices = @transform_1, window_bounds = array<i64: 128, 128>}, {transform_indices = @transform_2, window_bounds = array<i64: 8, 128>}]} {
    %c0_i32 = arith.constant 0 : i32
    %0 = arith.cmpi eq, %arg2, %c0_i32 : i32
    %1 = arith.extui %0 : i1 to i32
    %c0_i32_0 = arith.constant 0 : i32
    %2 = arith.cmpi ne, %1, %c0_i32_0 : i32
    scf.if %2 {
      %cst_8 = arith.constant 0.000000e+00 : f32
      %9 = vector.broadcast %cst_8 : f32 to vector<8x128xf32>
      %c0_9 = arith.constant 0 : index
      %c0_10 = arith.constant 0 : index
      %10 = vector.load %arg5[%c0_9, %c0_10] : memref<8x128xf32, #tpu.memory_space<vmem>>, vector<8x128xf32>
      tpu.vector_store %arg5[%c0_9, %c0_10], %9 {strides = array<i32>} : memref<8x128xf32, #tpu.memory_space<vmem>>, vector<8x128xf32>,
    } else {
    }
    %c0 = arith.constant 0 : index
    %c0_1 = arith.constant 0 : index
    %3 = vector.load %arg5[%c0, %c0_1] : memref<8x128xf32, #tpu.memory_space<vmem>>, vector<8x128xf32>
    %c0_2 = arith.constant 0 : index
    %c0_3 = arith.constant 0 : index
    %4 = vector.load %arg3[%c0_2, %c0_3] : memref<8x128xbf16, #tpu.memory_space<vmem>>, vector<8x128xbf16>
    %c0_4 = arith.constant 0 : index
    %c0_5 = arith.constant 0 : index
    %5 = vector.load %arg4[%c0_4, %c0_5] : memref<128x128xbf16, #tpu.memory_space<vmem>>, vector<128x128xbf16>
    %cst = arith.constant dense<0.000000e+00> : vector<8x128xf32>
    %6 = tpu.matmul %4, %5, %cst {dimension_numbers = #tpu.dot_dimension_numbers<[1], [0], [0], [1], [0, 0, 1, 1], [], []>} : vector<8x128xbf16>, vector<128x128xbf16>, vector<8x128xf32> -> vector<8x128xf32>
    %7 = arith.addf %3, %6 : vector<8x128xf32>
    %c0_6 = arith.constant 0 : index
    %c0_7 = arith.constant 0 : index
    %8 = vector.load %arg5[%c0_6, %c0_7] : memref<8x128xf32, #tpu.memory_space<vmem>>, vector<8x128xf32>
    tpu.vector_store %arg5[%c0_6, %c0_7], %7 {strides = array<i32>} : memref<8x128xf32, #tpu.memory_space<vmem>>, vector<8x128xf32>,
    return
  }
  func.func @transform_0(%arg0: i32, %arg1: i32, %arg2: i32) -> (i32, i32) {
    %c0_i32 = arith.constant 0 : i32
    return %arg0, %arg2 : i32, i32
  }
  func.func @transform_1(%arg0: i32, %arg1: i32, %arg2: i32) -> (i32, i32) {
    %c0_i32 = arith.constant 0 : i32
    return %arg2, %arg1 : i32, i32
  }
  func.func @transform_2(%arg0: i32, %arg1: i32, %arg2: i32) -> (i32, i32) {
    %c0_i32 = arith.constant 0 : i32
    return %arg0, %arg1 : i32, i32
  }
}

</mosaic_0001>

<bundles_post_ra>
// kernel: _apply_pinv_2d.1
= control target key start
LH: loop header
LB: loop body
LE: loop exit
PB: predicated region body
PF: predicated region fallthrough
CT: control target
= control target key end

     0   :  { %7 = vsyncpa [#allocation3], 0  ;;  %s801_s0 = inlined_call_operand.vmem [shape: bf16[8,128], index: 0, kind: input, shape index: {}]   ;;  %s802_s1 = inlined_call_operand.hbm [shape: bf16[128,256], index: 1, kind: input, shape index: {}]   ;;  %s803_s2 = inlined_call_operand.hbm [shape: f32[8,256], index: 2, kind: output, shape index: {}]  }
   0x1   :  { %9 = vsyncpa [#allocation3 + $0x1], 0 }
   0x2   :  { %10 = vsyncpa [#allocation4], 0 }
   0x3   :  { %12 = vsyncpa [#allocation4 + $0x1], 0  ;;  %s677_s9 = smov 0   ;;  %s679_s10 = smov 0  }
   0x4   :  { %s681_s11 = smov 0   ;;  %s683_s12 = smov 0  }
   0x5   :  { %s685_s13 = smov 0   ;;  %s687_s14 = smov 0  }
   0x6 LB: > { %s425_s15 = sadd.s32 4294967295, %s657_s14   ;;  %s426_s16 = sadd.s32 4294967294, %s657_s14   ;;  %s657_s14 = sphi %s687_s14, %s18_s14   ;;  %s653_s13 = sphi %s685_s13, %s812_s13   ;;  %s649_s12 = sphi %s683_s12, %s811_s12   ;;  %s645_s11 = sphi %s681_s11, %s810_s11   ;;  %s641_s10 = sphi %s679_s10, %s809_s10   ;;  %s637_s9 = sphi %s677_s9, %s808_s9  }
   0x7   : > { %s33_s17 = sadd.s32 1, %s653_s13  ;;  %s74_s18 = sadd.s32 1, %s645_s11 }
   0x8   : > { %p35_p0 = scmp.ge.s32.totalorder %s33_s17, 2  ;;  %p81_p1 = scmp.ne.s32.totalorder %s645_s11, %s641_s10 }
   0x9   : > { %p82_p2 = scmp.eq.s32.totalorder %s657_s14, 0  ;;  %p87_p3 = scmp.ne.s32.totalorder %s641_s10, %s637_s9 }
   0xa   : > { %s814_s17 = smov (%p35_p0, %s33_s17), 0  ;;  %p88_p5 = scmp.eq.s32.totalorder %s425_s15, 0 }
   0xb   : > { %p718_p4 = por %p82_p2, %p81_p1  ;;  %s70_s20 = ssub.s32 %s653_s13, %s814_s17 }
   0xc   : > { %p113_p6 = scmp.eq.s32.totalorder %s425_s15, 1  ;;  %p72_p7 = scmp.eq.s32.totalorder %s70_s20, 0 }
   0xd   : > { %p724_p8 = por %p88_p5, %p87_p3  ;;  %p119_p10 = scmp.eq.s32.totalorder %s426_s16, 1 }
   0xe   : > { %p728_p9 = por %p113_p6, %p81_p1  ;;  %p429_p12 = scmp.ge.s32.totalorder %s657_s14, 2 }
   0xf   : > { %s733_s23 = scalar_select %p72_p7, %s645_s11, %s74_s18  }
  0x10   : > { %p735_p11 = por %p119_p10, %p87_p3  ;;  %p491_p13 = scmp.lt.s32.totalorder %s657_s14, 2 }
  0x11   : > { %s149_s25 = sand.u32 1, %s645_s11   ;;  %s431_s27 = sshll.u32 %s653_s13, 2 }
  0x12   : > { %s430_s26 = sshll.u32 %s149_s25, 6  ;;  %s160_s30 = scalar_lea.hbm %s802_s1, %s431_s27 }
  0x13   : > { %s153_s3 = scalar_lea.vmem [#allocation2], %s430_s26  ;;  %s161_s5 = sshll.u32 %s160_s30, 4  ;;  %s162_s5 = int_to_ptr.hbm [resolvable:$true] %s161_s5 }
  0x14   : > { %s163_s4 = sshll.u32 %s153_s3, 4  ;;  %p484_p0 = pnand %p491_p13, %p718_p4  ;;  %s164_s4 = int_to_ptr.vmem [resolvable:$true] %s163_s4 }
  0x15   : > { %s150_s6 = scalar_lea.sflag [#allocation3], %s149_s25  ;;  %s659_s7 = smov 128  }
  0x16   : > { %s660_s8 = smov 64   ;;  %s661_s15 = smov 4  }
  0x17   : > { %486 = dma.hbm_to_vmem [thread:$0]  (!%p484_p0), %s162_s5, 1024, %s164_s4, %s150_s6, %s659_s7, %s660_s8, %s661_s15  }
  0x18   : > { %p432_p1 = scmp.ge.s32.totalorder %s657_s14, 1  ;;  %p171_p2 = scmp.lt.s32.totalorder %s657_s14, 3 }
  0x1a   : > { %p172_p3 = pnand %p432_p1, %p171_p2 }
  0x1b   : > { %s751_s16 = sand.u32 (!%p172_p3), 1, %s641_s10  }
  0x1c   : > { %175 = sbr.rel (%p172_p3) target bundleno = 200 (0xc8), region = 28  ;;  %s433_s18 = sshll.u32 (!%p172_p3), %s751_s16, 6 }
  0x1d   : > { %s178_s20 = scalar_lea.sflag (!%p172_p3), [#allocation3], %s751_s16  ;;  %s181_s26 = scalar_lea.vmem (!%p172_p3), [#allocation2], %s433_s18 }
  0x21   : > { %628 = dma.done.wait (%p724_p8), %s178_s20, 1024  }
  0x22   : > { %630 = vsyncadd (%p724_p8), %s178_s20, 4294966272  ;;  %v478_v0 = vld [vmem:[%s181_s26 + $0x38] sm:$0xff]  ;;  %v477_v1 = vld [vmem:[%s181_s26 + $0x30] sm:$0xff]  ;;  %s468_s25 = sshll.u32 %s649_s12, 3  ;;  %s434_s27 = sshll.u32 %s751_s16, 3 }
  0x23   : > { %289 = vmatpush.bf16.msra.mxu0 %v478_v0  ;;  %v476_v2 = vld [vmem:[%s181_s26 + $0x28] sm:$0xff]  ;;  %v475_v3 = vld [vmem:[%s181_s26 + $0x20] sm:$0xff]  ;;  %v474_v4 = vld [vmem:[%s181_s26 + $0x18] sm:$0xff]  ;;  %s317_s30 = scalar_lea.hbm %s803_s2, %s468_s25  ;;  %s209_s3 = scalar_lea.vmem [#allocation5], %s434_s27 }
  0x24   : > { %v473_v5 = vld [vmem:[%s181_s26 + $0x10] sm:$0xff]  ;;  %v472_v6 = vld [vmem:[%s181_s26 + $0x8] sm:$0xff]  ;;  %v471_v7 = vld [vmem:[%s181_s26] sm:$0xff]  ;;  %s319_s4 = sshll.u32 %s209_s3, 4  ;;  %s321_s5 = sshll.u32 %s317_s30, 4  ;;  %s320_s4 = int_to_ptr.vmem [resolvable:$true] %s319_s4  ;;  %s322_s5 = int_to_ptr.hbm [resolvable:$true] %s321_s5 }
  0x25   : > { %v224_v8 = vld [vmem:[%s801_s0] sm:$0xf]  ;;  %s305_s6 = scalar_lea.sflag [#allocation4], %s751_s16  ;;  %s589_s7 = sshra.s32 %s322_s5, 4  ;;  %s590_s7 = int_to_ptr.hbm [resolvable:$true] %s589_s7 }
  0x26   : > { %s591_s8 = scalar_lea.hbm %s590_s7, 8  ;;  %s595_s18 = scalar_lea.hbm %s803_s2, 16 }
  0x27   : > { %290 = vmatpush.bf16.msra.mxu0 %v477_v1  ;;  %p592_p4 = scmp.ne.s32.totalorder %s590_s7, %s591_s8  ;;  %p596_p7 = scmp.lt.s32.totalorder %s590_s7, %s803_s2 }
  0x28   : > { %p597_p8 = scmp.lt.s32.totalorder %s595_s18, %s591_s8 }
  0x29   : > { %p593_p5 = pnand %p592_p4, %p728_p9 }
  0x2a   : > { %p598_p10 = por %p597_p8, %p596_p7 }
  0x2b   : > { %291 = vmatpush.bf16.msra.mxu0 %v476_v2  ;;  %p594_p6 = pneg %p593_p5 }
  0x2d   : > { %p599_p13 = pnand %p598_p10, %p594_p6 }
  0x2f   : > { %292 = vmatpush.bf16.msra.mxu0 %v475_v3 }
  0x33   : > { %293 = vmatpush.bf16.msra.mxu0 %v474_v4 }
  0x37   : > { %294 = vmatpush.bf16.msra.mxu0 %v473_v5 }
  0x3b   : > { %295 = vmatpush.bf16.msra.mxu0 %v472_v6 }
  0x3f   : > { %296 = vmatpush.bf16.msra.mxu0 %v471_v7 }
  0x42   : > { %297 = vmatmul.bf16.vlgmr.msra.gmra.mxu0 %v224_v8 }
  0xbf   : > { %v298_v9 = vpop.f32.mrf.mxu0 }
  0xc0   : > { %303 = vst [vmem:[%s209_s3] sm:$0xff] %v298_v9 }
  0xc1   : > { %602 = shalt.err (!%p599_p13)
}
  0xc2   : > { %481 = dma.vmem_to_hbm [thread:$0]  (%p728_p9), %s320_s4, 128, %s322_s5, %s305_s6  }
  0xc7   : > { %v300_v10 = vpop.f32.mrf.mxu0 }
  0xc8 PF: > { %s333_s16 = sand.u32 1, %s637_s9   ;;  %p488_p0 = pnand %p429_p12, %p735_p11 }
  0xc9   : > { %s334_s19 = scalar_lea.sflag [#allocation4], %s333_s16 }
  0xca   : > { %p489_p1 = pneg %p488_p0 }
  0xcc   : > { %632 = dma.done.wait (%p489_p1), %s334_s19, 128  }
  0xcd   : > { %634 = vsyncadd (%p489_p1), %s334_s19, 4294967168  ;;  %s18_s14 = sadd.s32 1, %s657_s14   ;;  %s808_s9 = smov %s641_s10 }
  0xce   : > { %p15_p2 = scmp.ge.s32.totalorder %s18_s14, 4   ;;  %s809_s10 = smov %s645_s11 }
  0xcf   : > { %s810_s11 = smov %s733_s23  ;;  %s811_s12 = smov %s653_s13 }
  0xd0   : > { %s812_s13 = smov %s814_s17  ;;  %17 = sbr.rel (!%p15_p2) target bundleno = 6 (0x6), region = 80 }
  0xd5   :  { %340 = vsyncpa [#allocation3], 1 }
  0xd6   :  { %342 = vsyncpa [#allocation3 + $0x1], 1 }
  0xd7   :  { %343 = vsyncpa [#allocation4], 1 }
  0xd8   :  { %345 = vsyncpa [#allocation4 + $0x1], 1 }

</bundles_post_ra>
